<compile_context>
chip_gen: v5e
topology: v5e:2x2
jax: 0.10.0
libtpu: 0.0.40
codegen_flags: <defaults>
</compile_context>

<pallas_src>
import functools

import jax
import jax.numpy as jnp
from jax.experimental import pallas as pl
from jax.experimental.pallas import tpu as pltpu

LANE = 128          # vreg lane width: feature dims padded to multiples of this


def _round_up(n, m):
    return (n + m - 1) // m * m


def _cdiv(a, b):
    return -(-a // b)


@functools.lru_cache(maxsize=None)
def _vmem_budget_bytes():
    """Generation-aware VMEM budget (~75% of physical capacity)."""
    cap = 64 * 1024 * 1024                      # conservative fallback (v7x per-TC)
    try:
        info = pltpu.get_tpu_info()
        cap = int(getattr(info, "vmem_capacity_bytes", cap))
    except Exception:
        pass
    return max(cap * 3 // 4, 16 * 1024 * 1024)


# ---------------------------------------------------------------------------
# Kernels
# ---------------------------------------------------------------------------

def _resident_kernel(x_ref, wq_ref, bq_ref, w1_ref, b1_ref, w2_ref, b2_ref, o_ref):
    """Fused query_proj -> fc1 -> ReLU -> fc2, all weights VMEM-resident."""
    cdt = wq_ref.dtype                       # MXU operand dtype (f32 or bf16)
    x = x_ref[...].astype(cdt)
    q = jnp.dot(x, wq_ref[...], preferred_element_type=jnp.float32) + bq_ref[...]
    h = jnp.dot(q.astype(cdt), w1_ref[...], preferred_element_type=jnp.float32) + b1_ref[...]
    h = jnp.maximum(h, 0.0)
    out = jnp.dot(h.astype(cdt), w2_ref[...], preferred_element_type=jnp.float32) + b2_ref[...]
    o_ref[...] = out.astype(o_ref.dtype)


def _streamed_kernel(x_ref, wq_ref, bq_ref, w1_ref, b1_ref, w2_ref, b2_ref,
                     o_ref, q_scr, acc_scr):
    """Streamed-weight variant: hidden dim tiled on grid axis 1 ("arbitrary").

    q is computed once per row tile (h==0) into q_scr; fc2 accumulates per
    H-tile into a f32 VMEM accumulator; the output is written on the last
    H-tile only.
    """
    h_idx = pl.program_id(1)
    cdt = wq_ref.dtype

    @pl.when(h_idx == 0)
    def _():
        x = x_ref[...].astype(cdt)
        q_scr[...] = (jnp.dot(x, wq_ref[...], preferred_element_type=jnp.float32)
                      + bq_ref[...])
        acc_scr[...] = jnp.zeros_like(acc_scr)

    ht = (jnp.dot(q_scr[...].astype(cdt), w1_ref[...],
                  preferred_element_type=jnp.float32) + b1_ref[...])
    ht = jnp.maximum(ht, 0.0)                                    # ReLU per H-tile
    acc_scr[...] += jnp.dot(ht.astype(cdt), w2_ref[...],
                            preferred_element_type=jnp.float32)

    @pl.when(h_idx == pl.num_programs(1) - 1)
    def _():
        o_ref[...] = (acc_scr[...] + b2_ref[...]).astype(o_ref.dtype)


# ---------------------------------------------------------------------------
# VMEM sizing / tile selection
# ---------------------------------------------------------------------------

def _resident_vmem_bytes(tile_n, Dp, Hp, w_isz, x_isz, o_isz, weight_buf):
    weights = (Dp * Dp + 2 * Dp * Hp) * w_isz * weight_buf
    biases = (2 * Dp + Hp) * 4 * weight_buf
    io = 2 * tile_n * Dp * (x_isz + o_isz)          # double-buffered x / out tiles
    act = tile_n * (Dp + Hp) * 4                    # q / h intermediates (f32)
    return weights + biases + io + act


def _streamed_vmem_bytes(tile_n, Dp, Hp, h_tile, w_isz, x_isz, o_isz, weight_buf):
    del Hp
    wq = Dp * Dp * w_isz * weight_buf + 2 * Dp * 4 * weight_buf   # wq + bq + b2
    wh = 4 * Dp * h_tile * w_isz + 2 * h_tile * 4                 # w1/w2/b1 tiles, 2-buffered
    io = 2 * tile_n * Dp * (x_isz + o_isz)
    scr = 2 * tile_n * Dp * 4                                     # q_scr + acc_scr
    act = tile_n * h_tile * 4
    return wq + wh + io + scr + act


def _row_tile_candidates(n_rows, row_pack):
    """Large first (amortize ~0.35us/step, fill MXU M dim); small-input fallback."""
    cands = [t for t in (512, 256, 128) if n_rows >= 2 * t]
    cands.append(min(_round_up(n_rows, row_pack), 512))
    cands.append(_round_up(min(n_rows, 128), row_pack))
    out = []
    for t in cands:
        if t not in out:
            out.append(t)
    return out


# ---------------------------------------------------------------------------
# pallas_call wrappers (jitted, static tiling)
# ---------------------------------------------------------------------------

@functools.partial(
    jax.jit, static_argnames=("tile_n", "out_dtype", "vmem_limit", "single_buffer"))
def _forward_resident(x, wq, bq, w1, b1, w2, b2, *,
                      tile_n, out_dtype, vmem_limit, single_buffer):
    B, S, D = x.shape
    N = B * S
    Dp, Hp = wq.shape[0], w1.shape[1]
    cdt = wq.dtype

    x2d = x.reshape(N, D)
    if Dp != D:
        x2d = jnp.pad(x2d, ((0, 0), (0, Dp - D)))     # feature pad only (lane-dense)
    x2d = x2d.astype(cdt)                             # bf16 weights -> bf16 x DMA

    wmode = {"pipeline_mode": pl.Buffered(1)} if single_buffer else {}
    w_isz = jnp.dtype(cdt).itemsize
    o_isz = jnp.dtype(out_dtype).itemsize
    flops = 2 * N * (Dp * Dp + 2 * Dp * Hp)
    bytes_accessed = (N * Dp * (w_isz + o_isz)        # x read + out write
                      + (Dp * Dp + 2 * Dp * Hp) * w_isz + (2 * Dp + Hp) * 4)

    out2d = pl.pallas_call(
        _resident_kernel,
        out_shape=jax.ShapeDtypeStruct((N, Dp), out_dtype),
        grid_spec=pltpu.PrefetchScalarGridSpec(
            num_scalar_prefetch=0,
            grid=(_cdiv(N, tile_n),),
            in_specs=[
                pl.BlockSpec((tile_n, Dp), lambda i: (i, 0)),        # x rows
                pl.BlockSpec((Dp, Dp), lambda i: (0, 0), **wmode),   # Wq^T
                pl.BlockSpec((1, Dp), lambda i: (0, 0), **wmode),    # bq
                pl.BlockSpec((Dp, Hp), lambda i: (0, 0), **wmode),   # W1^T
                pl.BlockSpec((1, Hp), lambda i: (0, 0), **wmode),    # b1
                pl.BlockSpec((Hp, Dp), lambda i: (0, 0), **wmode),   # W2^T
                pl.BlockSpec((1, Dp), lambda i: (0, 0), **wmode),    # b2
            ],
            out_specs=pl.BlockSpec((tile_n, Dp), lambda i: (i, 0)),
        ),
        compiler_params=pltpu.CompilerParams(
            dimension_semantics=("parallel",),
            vmem_limit_bytes=vmem_limit),
        cost_estimate=pl.CostEstimate(
            flops=flops, transcendentals=0, bytes_accessed=bytes_accessed),
    )(x2d, wq, bq, w1, b1, w2, b2)

    return out2d[:, :D].reshape(B, S, D)


@functools.partial(
    jax.jit,
    static_argnames=("tile_n", "h_tile", "out_dtype", "vmem_limit", "single_buffer"))
def _forward_streamed(x, wq, bq, w1, b1, w2, b2, *,
                      tile_n, h_tile, out_dtype, vmem_limit, single_buffer):
    B, S, D = x.shape
    N = B * S
    Dp, Hp = wq.shape[0], w1.shape[1]
    cdt = wq.dtype

    x2d = x.reshape(N, D)
    if Dp != D:
        x2d = jnp.pad(x2d, ((0, 0), (0, Dp - D)))
    x2d = x2d.astype(cdt)

    wmode = {"pipeline_mode": pl.Buffered(1)} if single_buffer else {}
    n_row = _cdiv(N, tile_n)
    n_h = Hp // h_tile
    w_isz = jnp.dtype(cdt).itemsize
    o_isz = jnp.dtype(out_dtype).itemsize
    flops = 2 * N * (Dp * Dp + 2 * Dp * Hp)
    bytes_accessed = (N * Dp * (w_isz + o_isz) + Dp * Dp * w_isz
                      + n_row * 2 * Dp * Hp * w_isz + (2 * Dp + Hp) * 4)

    out2d = pl.pallas_call(
        _streamed_kernel,
        out_shape=jax.ShapeDtypeStruct((N, Dp), out_dtype),
        grid_spec=pltpu.PrefetchScalarGridSpec(
            num_scalar_prefetch=0,
            grid=(n_row, n_h),
            in_specs=[
                pl.BlockSpec((tile_n, Dp), lambda i, h: (i, 0)),        # x rows
                pl.BlockSpec((Dp, Dp), lambda i, h: (0, 0), **wmode),   # Wq^T (resident)
                pl.BlockSpec((1, Dp), lambda i, h: (0, 0), **wmode),    # bq
                pl.BlockSpec((Dp, h_tile), lambda i, h: (0, h)),        # W1^T H-tile
                pl.BlockSpec((1, h_tile), lambda i, h: (0, h)),         # b1 H-tile
                pl.BlockSpec((h_tile, Dp), lambda i, h: (h, 0)),        # W2^T H-tile
                pl.BlockSpec((1, Dp), lambda i, h: (0, 0), **wmode),    # b2
            ],
            out_specs=pl.BlockSpec((tile_n, Dp), lambda i, h: (i, 0)),
            scratch_shapes=[pltpu.VMEM((tile_n, Dp), jnp.float32),      # q scratch
                            pltpu.VMEM((tile_n, Dp), jnp.float32)],     # fc2 accumulator
        ),
        compiler_params=pltpu.CompilerParams(
            dimension_semantics=("parallel", "arbitrary"),
            vmem_limit_bytes=vmem_limit),
        cost_estimate=pl.CostEstimate(
            flops=flops, transcendentals=0, bytes_accessed=bytes_accessed),
    )(x2d, wq, bq, w1, b1, w2, b2)

    return out2d[:, :D].reshape(B, S, D)


# ---------------------------------------------------------------------------
# Public API
# ---------------------------------------------------------------------------

_STATE = {"single_buffer_weights": True}


def _call(fn, args, **static_kwargs):
    """Call with Buffered(1) weights; fall back once if unsupported."""
    if _STATE["single_buffer_weights"]:
        try:
            return fn(*args, single_buffer=True, **static_kwargs)
        except Exception:
            # TODO(synk): pl.Buffered(1) pipeline_mode rejected by this
            # jax/Mosaic version; fall back to default double-buffered weights.
            _STATE["single_buffer_weights"] = False
    return fn(*args, single_buffer=False, **static_kwargs)


def prepare_params(params, *, compute_dtype=jnp.float32):
    """One-time weight prep (NOT per forward): transpose torch-layout
    [out, in] -> [in, out], zero-pad feature dims to multiples of 128 lanes,
    optionally cast weights to bf16 (recommended default on v5e; MXU-native on
    v6e/v7x). Biases stay f32 and are added after f32 accumulation."""
    D = params["wq"].shape[0]
    H = params["w1"].shape[0]
    Dp, Hp = _round_up(D, LANE), _round_up(H, LANE)

    def padw(w_t, rows, cols):
        return jnp.pad(w_t, ((0, rows - w_t.shape[0]), (0, cols - w_t.shape[1])))

    def padb(b, cols):
        return jnp.pad(b.reshape(1, -1), ((0, 0), (0, cols - b.shape[0])))

    # TODO(synk): optional fp8(e4m3) weight path with per-channel scales for v7x.
    return {
        "wq": padw(params["wq"].T, Dp, Dp).astype(compute_dtype),
        "bq": padb(params["bq"], Dp).astype(jnp.float32),
        "w1": padw(params["w1"].T, Dp, Hp).astype(compute_dtype),
        "b1": padb(params["b1"], Hp).astype(jnp.float32),
        "w2": padw(params["w2"].T, Hp, Dp).astype(compute_dtype),
        "b2": padb(params["b2"], Dp).astype(jnp.float32),
    }


def memory_module_forward(x, prepped, *, force_streamed=False, row_tile=None, h_tile=None):
    """x: [B, S, D] (any D); prepped: output of prepare_params()."""
    B, S, D = x.shape
    N = B * S
    wq = prepped["wq"]
    Dp, Hp = wq.shape[0], prepped["w1"].shape[1]
    w_isz = jnp.dtype(wq.dtype).itemsize
    x_isz = w_isz                               # x tile is DMA'd in the compute dtype
    o_isz = jnp.dtype(x.dtype).itemsize
    row_pack = 8 * (4 // x_isz)                 # f32 -> 8 rows, bf16 -> 16 rows
    budget = _vmem_budget_bytes()
    wb = 1 if _STATE["single_buffer_weights"] else 2

    if row_tile is not None:
        cands = [_round_up(row_tile, row_pack)]
    else:
        cands = _row_tile_candidates(N, row_pack)

    args = (x, prepped["wq"], prepped["bq"], prepped["w1"], prepped["b1"],
            prepped["w2"], prepped["b2"])

    if not force_streamed:
        fitting = [t for t in cands
                   if _resident_vmem_bytes(t, Dp, Hp, w_isz, x_isz, o_isz, wb) <= budget]
        if fitting:
            # Prefer an even number of grid steps (v7x megacore load balance).
            even = [t for t in fitting
                    if _cdiv(N, t) >= 2 and _cdiv(N, t) % 2 == 0]
            tile_n = even[0] if even else fitting[0]
            return _call(_forward_resident, args, tile_n=tile_n,
                         out_dtype=x.dtype, vmem_limit=budget)

    # Streamed-weight path: hidden dim tiled on an "arbitrary" grid axis with a
    # VMEM accumulator (required for realistic dim/hidden, e.g. 4096/8192).
    if h_tile is not None:
        h_cands = [h_tile]
    else:
        h_cands = [d for d in range(Hp, 0, -LANE) if Hp % d == 0]
    for t in cands:
        for ht in h_cands:
            if ht % LANE != 0 or Hp % ht != 0:
                continue
            if _streamed_vmem_bytes(t, Dp, Hp, ht, w_isz, x_isz, o_isz, wb) <= budget:
                return _call(_forward_streamed, args, tile_n=t, h_tile=ht,
                             out_dtype=x.dtype, vmem_limit=budget)

    # TODO(synk): for weights where even Wq (Dp x Dp) exceeds VMEM, a third
    # reduction axis over Dp (streamed Wq with a q accumulator) is needed.
    raise NotImplementedError("weights too large even for the H-streamed path")


def reference_forward(x, params):
    # Pure-JAX reference mirroring the PyTorch module's forward.
    q = x @ params["wq"].T + params["bq"]
    h = jnp.maximum(q @ params["w1"].T + params["b1"], 0.0)
    return h @ params["w2"].T + params["b2"]


def init_params(key, dim, hidden):
    # Deterministic synthetic init (torch Linear layout: W is [out, in]).
    ks = jax.random.split(key, 6)
    sd = 1.0 / jnp.sqrt(dim)
    sh = 1.0 / jnp.sqrt(hidden)
    return {
        "wq": jax.random.uniform(ks[0], (dim, dim), jnp.float32, -sd, sd),
        "bq": jax.random.uniform(ks[1], (dim,), jnp.float32, -sd, sd),
        "w1": jax.random.uniform(ks[2], (hidden, dim), jnp.float32, -sd, sd),
        "b1": jax.random.uniform(ks[3], (hidden,), jnp.float32, -sd, sd),
        "w2": jax.random.uniform(ks[4], (dim, hidden), jnp.float32, -sh, sh),
        "b2": jax.random.uniform(ks[5], (dim,), jnp.float32, -sh, sh),
    }


if __name__ == "__main__":
    # Small shapes consistent with the module: batch=2, seq=8, dim=32, hidden=64.
    B, S, D, H = 2, 8, 32, 64
    key = jax.random.PRNGKey(0)
    kx, kp = jax.random.split(key)
    x = jax.random.normal(kx, (B, S, D), jnp.float32)
    params = init_params(kp, D, H)
    ref = reference_forward(x, params)

    # 1) f32 weights, fully VMEM-resident fused path: tight correctness check.
    prepped_f32 = prepare_params(params, compute_dtype=jnp.float32)
    out = jax.block_until_ready(memory_module_forward(x, prepped_f32))
    assert out.shape == (B, S, D)
    assert jnp.allclose(out, ref, atol=1e-4, rtol=1e-4), "f32 kernel mismatch"

    # 2) bf16 weights + bf16 activation DMA (MXU-native), f32 accumulation.
    prepped_bf16 = prepare_params(params, compute_dtype=jnp.bfloat16)
    out_bf = jax.block_until_ready(memory_module_forward(x, prepped_bf16))
    assert jnp.allclose(out_bf, ref, atol=7e-2, rtol=7e-2), "bf16 kernel mismatch"

    # 3) Streamed-weight path (H-tiled reduction grid axis + accumulator),
    #    with multiple H steps and a partial final row block.
    B2, S2, D2, H2 = 2, 20, 32, 320
    x2 = jax.random.normal(kx, (B2, S2, D2), jnp.float32)
    params2 = init_params(kp, D2, H2)
    ref2 = reference_forward(x2, params2)
    prepped2 = prepare_params(params2, compute_dtype=jnp.float32)
    out2 = jax.block_until_ready(
        memory_module_forward(x2, prepped2, force_streamed=True,
                              row_tile=16, h_tile=128))
    assert out2.shape == (B2, S2, D2)
    assert jnp.allclose(out2, ref2, atol=1e-4, rtol=1e-4), "streamed kernel mismatch"

    # TODO(synk): surprise()/update()/quantize() mutate parameters via autograd
    # and in-place int8 rounding; only the forward pass is implemented here.
    print("KERNEL_OK")
</pallas_src>

<mosaic_0001>
module attributes {stable_mosaic.version = 11 : i64} {
  func.func @_resident_kernel(%arg0: i32, %arg1: memref<16x128xf32, #tpu.memory_space<vmem>>, %arg2: memref<128x128xf32, #tpu.memory_space<vmem>>, %arg3: memref<1x128xf32, #tpu.memory_space<vmem>>, %arg4: memref<128x128xf32, #tpu.memory_space<vmem>>, %arg5: memref<1x128xf32, #tpu.memory_space<vmem>>, %arg6: memref<128x128xf32, #tpu.memory_space<vmem>>, %arg7: memref<1x128xf32, #tpu.memory_space<vmem>>, %arg8: memref<16x128xf32, #tpu.memory_space<vmem>>) attributes {dimension_semantics = [#tpu.dimension_semantics<parallel>], iteration_bounds = array<i64: 1>, scalar_prefetch = 0 : i64, scratch_operands = 0 : i64, tpu.core_type = #tpu.core_type<tc>, window_params = [{transform_indices = @transform_0, window_bounds = array<i64: 16, 128>}, {pipeline_mode = #tpu.pipeline_mode<synchronous>, transform_indices = @transform_1, window_bounds = array<i64: 128, 128>}, {pipeline_mode = #tpu.pipeline_mode<synchronous>, transform_indices = @transform_2, window_bounds = array<i64: 1, 128>}, {pipeline_mode = #tpu.pipeline_mode<synchronous>, transform_indices = @transform_3, window_bounds = array<i64: 128, 128>}, {pipeline_mode = #tpu.pipeline_mode<synchronous>, transform_indices = @transform_4, window_bounds = array<i64: 1, 128>}, {pipeline_mode = #tpu.pipeline_mode<synchronous>, transform_indices = @transform_5, window_bounds = array<i64: 128, 128>}, {pipeline_mode = #tpu.pipeline_mode<synchronous>, transform_indices = @transform_6, window_bounds = array<i64: 1, 128>}, {transform_indices = @transform_7, window_bounds = array<i64: 16, 128>}]} {
    %c0 = arith.constant 0 : index
    %c0_0 = arith.constant 0 : index
    %0 = vector.load %arg1[%c0, %c0_0] : memref<16x128xf32, #tpu.memory_space<vmem>>, vector<16x128xf32>
    %c0_1 = arith.constant 0 : index
    %c0_2 = arith.constant 0 : index
    %1 = vector.load %arg2[%c0_1, %c0_2] : memref<128x128xf32, #tpu.memory_space<vmem>>, vector<128x128xf32>
    %cst = arith.constant dense<0.000000e+00> : vector<16x128xf32>
    %2 = tpu.matmul %0, %1, %cst {dimension_numbers = #tpu.dot_dimension_numbers<[1], [0], [0], [1], [0, 0, 1, 1], [], []>} : vector<16x128xf32>, vector<128x128xf32>, vector<16x128xf32> -> vector<16x128xf32>
    %c0_3 = arith.constant 0 : index
    %c0_4 = arith.constant 0 : index
    %3 = vector.load %arg3[%c0_3, %c0_4] : memref<1x128xf32, #tpu.memory_space<vmem>>, vector<1x128xf32>
    %4 = vector.broadcast %3 : vector<1x128xf32> to vector<16x128xf32>
    %5 = arith.addf %2, %4 : vector<16x128xf32>
    %c0_5 = arith.constant 0 : index
    %c0_6 = arith.constant 0 : index
    %6 = vector.load %arg4[%c0_5, %c0_6] : memref<128x128xf32, #tpu.memory_space<vmem>>, vector<128x128xf32>
    %cst_7 = arith.constant dense<0.000000e+00> : vector<16x128xf32>
    %7 = tpu.matmul %5, %6, %cst_7 {dimension_numbers = #tpu.dot_dimension_numbers<[1], [0], [0], [1], [0, 0, 1, 1], [], []>} : vector<16x128xf32>, vector<128x128xf32>, vector<16x128xf32> -> vector<16x128xf32>
    %c0_8 = arith.constant 0 : index
    %c0_9 = arith.constant 0 : index
    %8 = vector.load %arg5[%c0_8, %c0_9] : memref<1x128xf32, #tpu.memory_space<vmem>>, vector<1x128xf32>
    %9 = vector.broadcast %8 : vector<1x128xf32> to vector<16x128xf32>
    %10 = arith.addf %7, %9 : vector<16x128xf32>
    %cst_10 = arith.constant 0.000000e+00 : f32
    %11 = vector.broadcast %cst_10 : f32 to vector<16x128xf32>
    %12 = arith.maximumf %10, %11 : vector<16x128xf32>
    %c0_11 = arith.constant 0 : index
    %c0_12 = arith.constant 0 : index
    %13 = vector.load %arg6[%c0_11, %c0_12] : memref<128x128xf32, #tpu.memory_space<vmem>>, vector<128x128xf32>
    %cst_13 = arith.constant dense<0.000000e+00> : vector<16x128xf32>
    %14 = tpu.matmul %12, %13, %cst_13 {dimension_numbers = #tpu.dot_dimension_numbers<[1], [0], [0], [1], [0, 0, 1, 1], [], []>} : vector<16x128xf32>, vector<128x128xf32>, vector<16x128xf32> -> vector<16x128xf32>
    %c0_14 = arith.constant 0 : index
    %c0_15 = arith.constant 0 : index
    %15 = vector.load %arg7[%c0_14, %c0_15] : memref<1x128xf32, #tpu.memory_space<vmem>>, vector<1x128xf32>
    %16 = vector.broadcast %15 : vector<1x128xf32> to vector<16x128xf32>
    %17 = arith.addf %14, %16 : vector<16x128xf32>
    %c0_16 = arith.constant 0 : index
    %c0_17 = arith.constant 0 : index
    %18 = vector.load %arg8[%c0_16, %c0_17] : memref<16x128xf32, #tpu.memory_space<vmem>>, vector<16x128xf32>
    tpu.vector_store %arg8[%c0_16, %c0_17], %17 {strides = array<i32>} : memref<16x128xf32, #tpu.memory_space<vmem>>, vector<16x128xf32>,
    return
  }
  func.func @transform_0(%arg0: i32) -> (i32, i32) {
    %c0_i32 = arith.constant 0 : i32
    %c0_i32_0 = arith.constant 0 : i32
    return %arg0, %c0_i32 : i32, i32
  }
  func.func @transform_1(%arg0: i32) -> (i32, i32) {
    %c0_i32 = arith.constant 0 : i32
    %c0_i32_0 = arith.constant 0 : i32
    %c0_i32_1 = arith.constant 0 : i32
    return %c0_i32, %c0_i32_0 : i32, i32
  }
  func.func @transform_2(%arg0: i32) -> (i32, i32) {
    %c0_i32 = arith.constant 0 : i32
    %c0_i32_0 = arith.constant 0 : i32
    %c0_i32_1 = arith.constant 0 : i32
    return %c0_i32, %c0_i32_0 : i32, i32
  }
  func.func @transform_3(%arg0: i32) -> (i32, i32) {
    %c0_i32 = arith.constant 0 : i32
    %c0_i32_0 = arith.constant 0 : i32
    %c0_i32_1 = arith.constant 0 : i32
    return %c0_i32, %c0_i32_0 : i32, i32
  }
  func.func @transform_4(%arg0: i32) -> (i32, i32) {
    %c0_i32 = arith.constant 0 : i32
    %c0_i32_0 = arith.constant 0 : i32
    %c0_i32_1 = arith.constant 0 : i32
    return %c0_i32, %c0_i32_0 : i32, i32
  }
  func.func @transform_5(%arg0: i32) -> (i32, i32) {
    %c0_i32 = arith.constant 0 : i32
    %c0_i32_0 = arith.constant 0 : i32
    %c0_i32_1 = arith.constant 0 : i32
    return %c0_i32, %c0_i32_0 : i32, i32
  }
  func.func @transform_6(%arg0: i32) -> (i32, i32) {
    %c0_i32 = arith.constant 0 : i32
    %c0_i32_0 = arith.constant 0 : i32
    %c0_i32_1 = arith.constant 0 : i32
    return %c0_i32, %c0_i32_0 : i32, i32
  }
  func.func @transform_7(%arg0: i32) -> (i32, i32) {
    %c0_i32 = arith.constant 0 : i32
    %c0_i32_0 = arith.constant 0 : i32
    return %arg0, %c0_i32 : i32, i32
  }
}

module attributes {stable_mosaic.version = 11 : i64} {
  func.func @_resident_kernel(%arg0: i32, %arg1: memref<16x128xf32, #tpu.memory_space<vmem>>, %arg2: memref<128x128xf32, #tpu.memory_space<vmem>>, %arg3: memref<1x128xf32, #tpu.memory_space<vmem>>, %arg4: memref<128x128xf32, #tpu.memory_space<vmem>>, %arg5: memref<1x128xf32, #tpu.memory_space<vmem>>, %arg6: memref<128x128xf32, #tpu.memory_space<vmem>>, %arg7: memref<1x128xf32, #tpu.memory_space<vmem>>, %arg8: memref<16x128xf32, #tpu.memory_space<vmem>>) attributes {dimension_semantics = [#tpu.dimension_semantics<parallel>], iteration_bounds = array<i64: 1>, scalar_prefetch = 0 : i64, scratch_operands = 0 : i64, tpu.core_type = #tpu.core_type<tc>, window_params = [{transform_indices = @transform_0, window_bounds = array<i64: 16, 128>}, {pipeline_mode = #tpu.pipeline_mode<synchronous>, transform_indices = @transform_1, window_bounds = array<i64: 128, 128>}, {pipeline_mode = #tpu.pipeline_mode<synchronous>, transform_indices = @transform_2, window_bounds = array<i64: 1, 128>}, {pipeline_mode = #tpu.pipeline_mode<synchronous>, transform_indices = @transform_3, window_bounds = array<i64: 128, 128>}, {pipeline_mode = #tpu.pipeline_mode<synchronous>, transform_indices = @transform_4, window_bounds = array<i64: 1, 128>}, {pipeline_mode = #tpu.pipeline_mode<synchronous>, transform_indices = @transform_5, window_bounds = array<i64: 128, 128>}, {pipeline_mode = #tpu.pipeline_mode<synchronous>, transform_indices = @transform_6, window_bounds = array<i64: 1, 128>}, {transform_indices = @transform_7, window_bounds = array<i64: 16, 128>}]} {
    %c0 = arith.constant 0 : index
    %c0_0 = arith.constant 0 : index
    %0 = vector.load %arg1[%c0, %c0_0] : memref<16x128xf32, #tpu.memory_space<vmem>>, vector<16x128xf32>
    %c0_1 = arith.constant 0 : index
    %c0_2 = arith.constant 0 : index
    %1 = vector.load %arg2[%c0_1, %c0_2] : memref<128x128xf32, #tpu.memory_space<vmem>>, vector<128x128xf32>
    %cst = arith.constant dense<0.000000e+00> : vector<16x128xf32>
    %2 = tpu.matmul %0, %1, %cst {dimension_numbers = #tpu.dot_dimension_numbers<[1], [0], [0], [1], [0, 0, 1, 1], [], []>} : vector<16x128xf32>, vector<128x128xf32>, vector<16x128xf32> -> vector<16x128xf32>
    %c0_3 = arith.constant 0 : index
    %c0_4 = arith.constant 0 : index
    %3 = vector.load %arg3[%c0_3, %c0_4] : memref<1x128xf32, #tpu.memory_space<vmem>>, vector<1x128xf32>
    %4 = vector.broadcast %3 : vector<1x128xf32> to vector<16x128xf32>
    %5 = arith.addf %2, %4 : vector<16x128xf32>
    %c0_5 = arith.constant 0 : index
    %c0_6 = arith.constant 0 : index
    %6 = vector.load %arg4[%c0_5, %c0_6] : memref<128x128xf32, #tpu.memory_space<vmem>>, vector<128x128xf32>
    %cst_7 = arith.constant dense<0.000000e+00> : vector<16x128xf32>
    %7 = tpu.matmul %5, %6, %cst_7 {dimension_numbers = #tpu.dot_dimension_numbers<[1], [0], [0], [1], [0, 0, 1, 1], [], []>} : vector<16x128xf32>, vector<128x128xf32>, vector<16x128xf32> -> vector<16x128xf32>
    %c0_8 = arith.constant 0 : index
    %c0_9 = arith.constant 0 : index
    %8 = vector.load %arg5[%c0_8, %c0_9] : memref<1x128xf32, #tpu.memory_space<vmem>>, vector<1x128xf32>
    %9 = vector.broadcast %8 : vector<1x128xf32> to vector<16x128xf32>
    %10 = arith.addf %7, %9 : vector<16x128xf32>
    %cst_10 = arith.constant 0.000000e+00 : f32
    %11 = vector.broadcast %cst_10 : f32 to vector<16x128xf32>
    %12 = arith.maximumf %10, %11 : vector<16x128xf32>
    %c0_11 = arith.constant 0 : index
    %c0_12 = arith.constant 0 : index
    %13 = vector.load %arg6[%c0_11, %c0_12] : memref<128x128xf32, #tpu.memory_space<vmem>>, vector<128x128xf32>
    %cst_13 = arith.constant dense<0.000000e+00> : vector<16x128xf32>
    %14 = tpu.matmul %12, %13, %cst_13 {dimension_numbers = #tpu.dot_dimension_numbers<[1], [0], [0], [1], [0, 0, 1, 1], [], []>} : vector<16x128xf32>, vector<128x128xf32>, vector<16x128xf32> -> vector<16x128xf32>
    %c0_14 = arith.constant 0 : index
    %c0_15 = arith.constant 0 : index
    %15 = vector.load %arg7[%c0_14, %c0_15] : memref<1x128xf32, #tpu.memory_space<vmem>>, vector<1x128xf32>
    %16 = vector.broadcast %15 : vector<1x128xf32> to vector<16x128xf32>
    %17 = arith.addf %14, %16 : vector<16x128xf32>
    %c0_16 = arith.constant 0 : index
    %c0_17 = arith.constant 0 : index
    %18 = vector.load %arg8[%c0_16, %c0_17] : memref<16x128xf32, #tpu.memory_space<vmem>>, vector<16x128xf32>
    tpu.vector_store %arg8[%c0_16, %c0_17], %17 {strides = array<i32>} : memref<16x128xf32, #tpu.memory_space<vmem>>, vector<16x128xf32>,
    return
  }
  func.func @transform_0(%arg0: i32) -> (i32, i32) {
    %c0_i32 = arith.constant 0 : i32
    %c0_i32_0 = arith.constant 0 : i32
    return %arg0, %c0_i32 : i32, i32
  }
  func.func @transform_1(%arg0: i32) -> (i32, i32) {
    %c0_i32 = arith.constant 0 : i32
    %c0_i32_0 = arith.constant 0 : i32
    %c0_i32_1 = arith.constant 0 : i32
    return %c0_i32, %c0_i32_0 : i32, i32
  }
  func.func @transform_2(%arg0: i32) -> (i32, i32) {
    %c0_i32 = arith.constant 0 : i32
    %c0_i32_0 = arith.constant 0 : i32
    %c0_i32_1 = arith.constant 0 : i32
    return %c0_i32, %c0_i32_0 : i32, i32
  }
  func.func @transform_3(%arg0: i32) -> (i32, i32) {
    %c0_i32 = arith.constant 0 : i32
    %c0_i32_0 = arith.constant 0 : i32
    %c0_i32_1 = arith.constant 0 : i32
    return %c0_i32, %c0_i32_0 : i32, i32
  }
  func.func @transform_4(%arg0: i32) -> (i32, i32) {
    %c0_i32 = arith.constant 0 : i32
    %c0_i32_0 = arith.constant 0 : i32
    %c0_i32_1 = arith.constant 0 : i32
    return %c0_i32, %c0_i32_0 : i32, i32
  }
  func.func @transform_5(%arg0: i32) -> (i32, i32) {
    %c0_i32 = arith.constant 0 : i32
    %c0_i32_0 = arith.constant 0 : i32
    %c0_i32_1 = arith.constant 0 : i32
    return %c0_i32, %c0_i32_0 : i32, i32
  }
  func.func @transform_6(%arg0: i32) -> (i32, i32) {
    %c0_i32 = arith.constant 0 : i32
    %c0_i32_0 = arith.constant 0 : i32
    %c0_i32_1 = arith.constant 0 : i32
    return %c0_i32, %c0_i32_0 : i32, i32
  }
  func.func @transform_7(%arg0: i32) -> (i32, i32) {
    %c0_i32 = arith.constant 0 : i32
    %c0_i32_0 = arith.constant 0 : i32
    return %arg0, %c0_i32 : i32, i32
  }
}

</mosaic_0001>

<bundles_post_ra>
// kernel: _forward_resident.1
= control target key start
LH: loop header
LB: loop body
LE: loop exit
PB: predicated region body
PF: predicated region fallthrough
CT: control target
= control target key end

     0   :  { %12 = vsyncpa [#allocation3], 0  ;;  %s389_s0 = inlined_call_operand.vmem [shape: f32[16,128], index: 0, kind: input, shape index: {}]   ;;  %s390_s1 = inlined_call_operand.hbm [shape: f32[128,128], index: 1, kind: input, shape index: {}]   ;;  %s391_s2 = inlined_call_operand.vmem [shape: f32[1,128], index: 2, kind: input, shape index: {}]   ;;  %s392_s3 = inlined_call_operand.hbm [shape: f32[128,128], index: 3, kind: input, shape index: {}]   ;;  %s393_s4 = inlined_call_operand.vmem [shape: f32[1,128], index: 4, kind: input, shape index: {}]   ;;  %s394_s5 = inlined_call_operand.hbm [shape: f32[128,128], index: 5, kind: input, shape index: {}]   ;;  %s395_s6 = inlined_call_operand.vmem [shape: f32[1,128], index: 6, kind: input, shape index: {}]   ;;  %s396_s7 = inlined_call_operand.vmem [shape: f32[16,128], index: 7, kind: output, shape index: {}]  }
   0x1   :  { %13 = vsyncpa [#allocation5], 0  ;;  %s35_s26 = sshll.u32 %s392_s3, 4  ;;  %s314_s27 = smov [#allocation4]   ;;  %s36_s26 = int_to_ptr.hbm [resolvable:$true] %s35_s26 }
   0x2   :  { %s37_s28 = sshll.u32 %s314_s27, 4  ;;  %s20_s8 = sshll.u32 %s390_s1, 4  ;;  %s38_s28 = int_to_ptr.vmem [resolvable:$true] %s37_s28  ;;  %s21_s8 = int_to_ptr.hbm [resolvable:$true] %s20_s8 }
   0x3   :  { %s315_s9 = smov 128   ;;  %s316_s10 = smov 8  }
   0x4   :  { %43 = dma.hbm_to_vmem [thread:$0]  %s36_s26, 2048, %s38_s28, [#allocation5], %s315_s9, %s315_s9, %s316_s10  }
   0x5   :  { %s317_s11 = smov [#allocation2]   ;;  %s50_s15 = sshll.u32 %s394_s5, 4  ;;  %s51_s15 = int_to_ptr.hbm [resolvable:$true] %s50_s15 }
   0x6   :  { %s22_s12 = sshll.u32 %s317_s11, 4  ;;  %s318_s3 = smov [#allocation6]   ;;  %s23_s12 = int_to_ptr.vmem [resolvable:$true] %s22_s12 }
   0x7   :  { %28 = dma.hbm_to_vmem [thread:$0]  %s21_s8, 2048, %s23_s12, [#allocation3], %s315_s9, %s315_s9, %s316_s10  }
   0x8   :  { %s52_s16 = sshll.u32 %s318_s3, 4  ;;  %s53_s16 = int_to_ptr.vmem [resolvable:$true] %s52_s16 }
   0x9   :  { %58 = dma.hbm_to_vmem [thread:$0]  %s51_s15, 2048, %s53_s16, [#allocation5], %s315_s9, %s315_s9, %s316_s10  }
   0xa   :  { %310 = dma.done.wait [#allocation3], 2048  }
   0xb   :  { %311 = vsyncadd [#allocation3], 4294965248 }
   0xc   :  { %312 = dma.done.wait [#allocation5], 4096  }
   0xd   :  { %313 = vsyncadd [#allocation5], 4294963200  ;;  %v90_v0 = vld [vmem:[#allocation2 + $0x78] sm:$0xff]  ;;  %v89_v1 = vld [vmem:[#allocation2 + $0x70] sm:$0xff] }
   0xe   :  { %95 = vmatpush.msra.mxu0 %v90_v0  ;;  %214 = vmatpush.msra.mxu3 %v90_v0  ;;  %v88_v2 = vld [vmem:[#allocation2 + $0x68] sm:$0xff]  ;;  %v87_v3 = vld [vmem:[#allocation2 + $0x60] sm:$0xff]  ;;  %v86_v4 = vld [vmem:[#allocation2 + $0x58] sm:$0xff] }
   0xf   :  { %v133_v5 = vld [vmem:[#allocation4 + $0x78] sm:$0xff]  ;;  %v132_v6 = vld [vmem:[#allocation4 + $0x70] sm:$0xff]  ;;  %v131_v8 = vld [vmem:[#allocation4 + $0x68] sm:$0xff] }
  0x10   :  { %96 = vmatpush.msra.mxu0 %v89_v1  ;;  %215 = vmatpush.msra.mxu3 %v89_v1  ;;  %v85_v7 = vld [vmem:[#allocation2 + $0x50] sm:$0xff]  ;;  %v84_v9 = vld [vmem:[#allocation2 + $0x48] sm:$0xff]  ;;  %v130_v10 = vld [vmem:[#allocation4 + $0x60] sm:$0xff] }
  0x11   :  { %138 = vmatpush.msra.mxu1 %v133_v5  ;;  %v83_v11 = vld [vmem:[#allocation2 + $0x40] sm:$0xff]  ;;  %v129_v12 = vld [vmem:[#allocation4 + $0x58] sm:$0xff]  ;;  %v128_v14 = vld [vmem:[#allocation4 + $0x50] sm:$0xff] }
  0x12   :  { %97 = vmatpush.msra.mxu0 %v88_v2  ;;  %216 = vmatpush.msra.mxu3 %v88_v2  ;;  %v82_v13 = vld [vmem:[#allocation2 + $0x38] sm:$0xff]  ;;  %v81_v15 = vld [vmem:[#allocation2 + $0x30] sm:$0xff]  ;;  %v127_v16 = vld [vmem:[#allocation4 + $0x48] sm:$0xff] }
  0x13   :  { %139 = vmatpush.msra.mxu1 %v132_v6  ;;  %v80_v17 = vld [vmem:[#allocation2 + $0x28] sm:$0xff]  ;;  %v126_v18 = vld [vmem:[#allocation4 + $0x40] sm:$0xff]  ;;  %v125_v20 = vld [vmem:[#allocation4 + $0x38] sm:$0xff] }
  0x14   :  { %98 = vmatpush.msra.mxu0 %v87_v3  ;;  %217 = vmatpush.msra.mxu3 %v87_v3  ;;  %v79_v19 = vld [vmem:[#allocation2 + $0x20] sm:$0xff]  ;;  %v78_v21 = vld [vmem:[#allocation2 + $0x18] sm:$0xff]  ;;  %v124_v22 = vld [vmem:[#allocation4 + $0x30] sm:$0xff] }
  0x15   :  { %140 = vmatpush.msra.mxu1 %v131_v8  ;;  %v77_v23 = vld [vmem:[#allocation2 + $0x10] sm:$0xff]  ;;  %v123_v24 = vld [vmem:[#allocation4 + $0x28] sm:$0xff]  ;;  %v122_v26 = vld [vmem:[#allocation4 + $0x20] sm:$0xff] }
  0x16   :  { %99 = vmatpush.msra.mxu0 %v86_v4  ;;  %218 = vmatpush.msra.mxu3 %v86_v4  ;;  %v76_v25 = vld [vmem:[#allocation2 + $0x8] sm:$0xff]  ;;  %v75_v27 = vld [vmem:[#allocation2] sm:$0xff]  ;;  %v121_v30 = vld [vmem:[#allocation4 + $0x18] sm:$0xff] }
  0x17   :  { %141 = vmatpush.msra.mxu1 %v130_v10  ;;  %v73_v28 = vld [vmem:[%s389_s0] sm:$0xff]  ;;  %v74_v29 = vld [vmem:[%s389_s0 + $0x8] sm:$0xff]  ;;  %v120_v31 = vld [vmem:[#allocation4 + $0x10] sm:$0xff] }
  0x18   :  { %100 = vmatpush.msra.mxu0 %v85_v7  ;;  %219 = vmatpush.msra.mxu3 %v85_v7  ;;  %v119_v32 = vld [vmem:[#allocation4 + $0x8] sm:$0xff]  ;;  %v118_v33 = vld [vmem:[#allocation4] sm:$0xff]  ;;  %v178_v34 = vld [vmem:[#allocation6 + $0x78] sm:$0xff] }
  0x19   :  { %142 = vmatpush.msra.mxu1 %v129_v12  ;;  %v177_v35 = vld [vmem:[#allocation6 + $0x70] sm:$0xff]  ;;  %183 = vmatpush.msra.mxu2 %v178_v34  ;;  %v176_v36 = vld [vmem:[#allocation6 + $0x68] sm:$0xff]  ;;  %v175_v37 = vld [vmem:[#allocation6 + $0x60] sm:$0xff] }
  0x1a   :  { %101 = vmatpush.msra.mxu0 %v84_v9  ;;  %220 = vmatpush.msra.mxu3 %v84_v9  ;;  %v174_v38 = vld [vmem:[#allocation6 + $0x58] sm:$0xff]  ;;  %v173_v39 = vld [vmem:[#allocation6 + $0x50] sm:$0xff]  ;;  %v172_v40 = vld [vmem:[#allocation6 + $0x48] sm:$0xff] }
  0x1b   :  { %143 = vmatpush.msra.mxu1 %v128_v14  ;;  %184 = vmatpush.msra.mxu2 %v177_v35  ;;  %v171_v41 = vld [vmem:[#allocation6 + $0x40] sm:$0xff]  ;;  %v170_v42 = vld [vmem:[#allocation6 + $0x38] sm:$0xff]  ;;  %v169_v43 = vld [vmem:[#allocation6 + $0x30] sm:$0xff] }
  0x1c   :  { %102 = vmatpush.msra.mxu0 %v83_v11  ;;  %221 = vmatpush.msra.mxu3 %v83_v11  ;;  %v235_v44 = vld [vmem:[%s391_s2] ss:$0 sm:$0xff]  ;;  %v168_v45 = vld [vmem:[#allocation6 + $0x28] sm:$0xff]  ;;  %v166_v49 = vld [vmem:[#allocation6 + $0x18] sm:$0xff] }
  0x1d   :  { %144 = vmatpush.msra.mxu1 %v127_v16  ;;  %185 = vmatpush.msra.mxu2 %v176_v36  ;;  %v167_v46 = vld [vmem:[#allocation6 + $0x20] sm:$0xff]  ;;  %v165_v52 = vld [vmem:[#allocation6 + $0x10] sm:$0xff]  ;;  %v164_v53 = vld [vmem:[#allocation6 + $0x8] sm:$0xff] }
  0x1e   :  { %103 = vmatpush.msra.mxu0 %v82_v13  ;;  %222 = vmatpush.msra.mxu3 %v82_v13  ;;  %v163_v54 = vld [vmem:[#allocation6] sm:$0xff] }
  0x1f   :  { %145 = vmatpush.msra.mxu1 %v126_v18  ;;  %186 = vmatpush.msra.mxu2 %v175_v37  ;;  %v236_v55 = vld [vmem:[%s393_s4] ss:$0 sm:$0xff] }
  0x20   :  { %104 = vmatpush.msra.mxu0 %v81_v15  ;;  %223 = vmatpush.msra.mxu3 %v81_v15  ;;  %v237_v62 = vld [vmem:[%s395_s6] ss:$0 sm:$0xff] }
  0x21   :  { %146 = vmatpush.msra.mxu1 %v125_v20  ;;  %187 = vmatpush.msra.mxu2 %v174_v38 }
  0x22   :  { %105 = vmatpush.msra.mxu0 %v80_v17  ;;  %224 = vmatpush.msra.mxu3 %v80_v17 }
  0x23   :  { %147 = vmatpush.msra.mxu1 %v124_v22  ;;  %188 = vmatpush.msra.mxu2 %v173_v39 }
  0x24   :  { %106 = vmatpush.msra.mxu0 %v79_v19  ;;  %225 = vmatpush.msra.mxu3 %v79_v19 }
  0x25   :  { %148 = vmatpush.msra.mxu1 %v123_v24  ;;  %189 = vmatpush.msra.mxu2 %v172_v40 }
  0x26   :  { %107 = vmatpush.msra.mxu0 %v78_v21  ;;  %226 = vmatpush.msra.mxu3 %v78_v21 }
  0x27   :  { %149 = vmatpush.msra.mxu1 %v122_v26  ;;  %190 = vmatpush.msra.mxu2 %v171_v41 }
  0x28   :  { %108 = vmatpush.msra.mxu0 %v77_v23  ;;  %227 = vmatpush.msra.mxu3 %v77_v23 }
  0x29   :  { %150 = vmatpush.msra.mxu1 %v121_v30  ;;  %191 = vmatpush.msra.mxu2 %v170_v42 }
  0x2a   :  { %109 = vmatpush.msra.mxu0 %v76_v25  ;;  %228 = vmatpush.msra.mxu3 %v76_v25 }
  0x2b   :  { %151 = vmatpush.msra.mxu1 %v120_v31  ;;  %192 = vmatpush.msra.mxu2 %v169_v43 }
  0x2c   :  { %110 = vmatpush.msra.mxu0 %v75_v27  ;;  %229 = vmatpush.msra.mxu3 %v75_v27 }
  0x2d   :  { %111 = vmatmul.f32.vlgmr.msra.gmra.mxu0 %v73_v28  ;;  %114 = vmatmul.f32.vlgmr.msra.gmra.mxu3 %v74_v29 }
  0x2e   :  { %152 = vmatpush.msra.mxu1 %v119_v32  ;;  %193 = vmatpush.msra.mxu2 %v168_v45 }
  0x30   :  { %153 = vmatpush.msra.mxu1 %v118_v33  ;;  %194 = vmatpush.msra.mxu2 %v167_v46 }
  0x32   :  { %195 = vmatpush.msra.mxu2 %v166_v49 }
  0x34   :  { %196 = vmatpush.msra.mxu2 %v165_v52 }
  0x36   :  { %197 = vmatpush.msra.mxu2 %v164_v53 }
  0x38   :  { %198 = vmatpush.msra.mxu2 %v163_v54 }
  0xaa   :  { %v112_v47 = vpop.f32.mrf.mxu0 }
  0xab   :  { %v113_v48 = vadd.f32 %v235_v44, %v112_v47 }
  0xad   :  { %154 = vmatmul.f32.vlgmr.msra.gmra.mxu1 %v113_v48 }
  0xb0   :  { %v115_v50 = vpop.f32.mrf.mxu3 }
  0xb1   :  { %v116_v51 = vadd.f32 %v235_v44, %v115_v50 }
  0xb5   :  { %157 = vmatmul.f32.gmra.mxu1 %v116_v51 }
 0x12a   :  { %v155_v56 = vpop.f32.mrf.mxu1 }
 0x12b   :  { %v156_v57 = vadd.f32 %v236_v55, %v155_v56 }
 0x12d   :  { %v161_v58 = vmax.f32 %v156_v57, 0.0 }
 0x12f   :  { %199 = vmatmul.f32.vlgmr.msra.gmra.mxu2 %v161_v58 }
 0x132   :  { %v158_v59 = vpop.f32.mrf.mxu1 }
 0x133   :  { %v159_v60 = vadd.f32 %v236_v55, %v158_v59 }
 0x135   :  { %v162_v61 = vmax.f32 %v159_v60, 0.0 }
 0x137   :  { %202 = vmatmul.f32.gmra.mxu2 %v162_v61 }
 0x1b2   :  { %v200_v63 = vpop.f32.mrf.mxu2 }
 0x1b3   :  { %v201_v0 = vadd.f32 %v237_v62, %v200_v63 }
 0x1b5   :  { %206 = vst [vmem:[%s396_s7] sm:$0xff] %v201_v0 }
 0x1ba   :  { %v203_v1 = vpop.f32.mrf.mxu2 }
 0x1bb   :  { %v204_v2 = vadd.f32 %v237_v62, %v203_v1 }
 0x1bd   :  { %207 = vst [vmem:[%s396_s7 + $0x8] sm:$0xff] %v204_v2 }
 0x1be   :  { %212 = vsyncpa [#allocation3], 1 }
 0x1bf   :  { %213 = vsyncpa [#allocation5], 1 }

// kernel: _forward_resident.1
= control target key start
LH: loop header
LB: loop body
LE: loop exit
PB: predicated region body
PF: predicated region fallthrough
CT: control target
= control target key end

     0   :  { %12 = vsyncpa [#allocation3], 0  ;;  %s389_s0 = inlined_call_operand.vmem [shape: f32[16,128], index: 0, kind: input, shape index: {}]   ;;  %s390_s1 = inlined_call_operand.hbm [shape: f32[128,128], index: 1, kind: input, shape index: {}]   ;;  %s391_s2 = inlined_call_operand.vmem [shape: f32[1,128], index: 2, kind: input, shape index: {}]   ;;  %s392_s3 = inlined_call_operand.hbm [shape: f32[128,128], index: 3, kind: input, shape index: {}]   ;;  %s393_s4 = inlined_call_operand.vmem [shape: f32[1,128], index: 4, kind: input, shape index: {}]   ;;  %s394_s5 = inlined_call_operand.hbm [shape: f32[128,128], index: 5, kind: input, shape index: {}]   ;;  %s395_s6 = inlined_call_operand.vmem [shape: f32[1,128], index: 6, kind: input, shape index: {}]   ;;  %s396_s7 = inlined_call_operand.vmem [shape: f32[16,128], index: 7, kind: output, shape index: {}]  }
   0x1   :  { %13 = vsyncpa [#allocation5], 0  ;;  %s35_s26 = sshll.u32 %s392_s3, 4  ;;  %s314_s27 = smov [#allocation4]   ;;  %s36_s26 = int_to_ptr.hbm [resolvable:$true] %s35_s26 }
   0x2   :  { %s37_s28 = sshll.u32 %s314_s27, 4  ;;  %s20_s8 = sshll.u32 %s390_s1, 4  ;;  %s38_s28 = int_to_ptr.vmem [resolvable:$true] %s37_s28  ;;  %s21_s8 = int_to_ptr.hbm [resolvable:$true] %s20_s8 }
   0x3   :  { %s315_s9 = smov 128   ;;  %s316_s10 = smov 8  }
   0x4   :  { %43 = dma.hbm_to_vmem [thread:$0]  %s36_s26, 2048, %s38_s28, [#allocation5], %s315_s9, %s315_s9, %s316_s10  }
   0x5   :  { %s317_s11 = smov [#allocation2]   ;;  %s50_s15 = sshll.u32 %s394_s5, 4  ;;  %s51_s15 = int_to_ptr.hbm [resolvable:$true] %s50_s15 }
   0x6   :  { %s22_s12 = sshll.u32 %s317_s11, 4  ;;  %s318_s3 = smov [#allocation6]   ;;  %s23_s12 = int_to_ptr.vmem [resolvable:$true] %s22_s12 }
   0x7   :  { %28 = dma.hbm_to_vmem [thread:$0]  %s21_s8, 2048, %s23_s12, [#allocation3], %s315_s9, %s315_s9, %s316_s10  }
   0x8   :  { %s52_s16 = sshll.u32 %s318_s3, 4  ;;  %s53_s16 = int_to_ptr.vmem [resolvable:$true] %s52_s16 }
   0x9   :  { %58 = dma.hbm_to_vmem [thread:$0]  %s51_s15, 2048, %s53_s16, [#allocation5], %s315_s9, %s315_s9, %s316_s10  }
   0xa   :  { %310 = dma.done.wait [#allocation3], 2048  }
   0xb   :  { %311 = vsyncadd [#allocation3], 4294965248 }
   0xc   :  { %312 = dma.done.wait [#allocation5], 4096  }
   0xd   :  { %313 = vsyncadd [#allocation5], 4294963200  ;;  %v90_v0 = vld [vmem:[#allocation2 + $0x78] sm:$0xff]  ;;  %v89_v1 = vld [vmem:[#allocation2 + $0x70] sm:$0xff] }
   0xe   :  { %95 = vmatpush.msra.mxu0 %v90_v0  ;;  %214 = vmatpush.msra.mxu3 %v90_v0  ;;  %v88_v2 = vld [vmem:[#allocation2 + $0x68] sm:$0xff]  ;;  %v87_v3 = vld [vmem:[#allocation2 + $0x60] sm:$0xff]  ;;  %v86_v4 = vld [vmem:[#allocation2 + $0x58] sm:$0xff] }
   0xf   :  { %v133_v5 = vld [vmem:[#allocation4 + $0x78] sm:$0xff]  ;;  %v132_v6 = vld [vmem:[#allocation4 + $0x70] sm:$0xff]  ;;  %v131_v8 = vld [vmem:[#allocation4 + $0x68] sm:$0xff] }
  0x10   :  { %96 = vmatpush.msra.mxu0 %v89_v1  ;;  %215 = vmatpush.msra.mxu3 %v89_v1  ;;  %v85_v7 = vld [vmem:[#allocation2 + $0x50] sm:$0xff]  ;;  %v84_v9 = vld [vmem:[#allocation2 + $0x48] sm:$0xff]  ;;  %v130_v10 = vld [vmem:[#allocation4 + $0x60] sm:$0xff] }
  0x11   :  { %138 = vmatpush.msra.mxu1 %v133_v5  ;;  %v83_v11 = vld [vmem:[#allocation2 + $0x40] sm:$0xff]  ;;  %v129_v12 = vld [vmem:[#allocation4 + $0x58] sm:$0xff]  ;;  %v128_v14 = vld [vmem:[#allocation4 + $0x50] sm:$0xff] }
  0x12   :  { %97 = vmatpush.msra.mxu0 %v88_v2  ;;  %216 = vmatpush.msra.mxu3 %v88_v2  ;;  %v82_v13 = vld [vmem:[#allocation2 + $0x38] sm:$0xff]  ;;  %v81_v15 = vld [vmem:[#allocation2 + $0x30] sm:$0xff]  ;;  %v127_v16 = vld [vmem:[#allocation4 + $0x48] sm:$0xff] }
  0x13   :  { %139 = vmatpush.msra.mxu1 %v132_v6  ;;  %v80_v17 = vld [vmem:[#allocation2 + $0x28] sm:$0xff]  ;;  %v126_v18 = vld [vmem:[#allocation4 + $0x40] sm:$0xff]  ;;  %v125_v20 = vld [vmem:[#allocation4 + $0x38] sm:$0xff] }
  0x14   :  { %98 = vmatpush.msra.mxu0 %v87_v3  ;;  %217 = vmatpush.msra.mxu3 %v87_v3  ;;  %v79_v19 = vld [vmem:[#allocation2 + $0x20] sm:$0xff]  ;;  %v78_v21 = vld [vmem:[#allocation2 + $0x18] sm:$0xff]  ;;  %v124_v22 = vld [vmem:[#allocation4 + $0x30] sm:$0xff] }
  0x15   :  { %140 = vmatpush.msra.mxu1 %v131_v8  ;;  %v77_v23 = vld [vmem:[#allocation2 + $0x10] sm:$0xff]  ;;  %v123_v24 = vld [vmem:[#allocation4 + $0x28] sm:$0xff]  ;;  %v122_v26 = vld [vmem:[#allocation4 + $0x20] sm:$0xff] }
  0x16   :  { %99 = vmatpush.msra.mxu0 %v86_v4  ;;  %218 = vmatpush.msra.mxu3 %v86_v4  ;;  %v76_v25 = vld [vmem:[#allocation2 + $0x8] sm:$0xff]  ;;  %v75_v27 = vld [vmem:[#allocation2] sm:$0xff]  ;;  %v121_v30 = vld [vmem:[#allocation4 + $0x18] sm:$0xff] }
  0x17   :  { %141 = vmatpush.msra.mxu1 %v130_v10  ;;  %v73_v28 = vld [vmem:[%s389_s0] sm:$0xff]  ;;  %v74_v29 = vld [vmem:[%s389_s0 + $0x8] sm:$0xff]  ;;  %v120_v31 = vld [vmem:[#allocation4 + $0x10] sm:$0xff] }
  0x18   :  { %100 = vmatpush.msra.mxu0 %v85_v7  ;;  %219 = vmatpush.msra.mxu3 %v85_v7  ;;  %v119_v32 = vld [vmem:[#allocation4 + $0x8] sm:$0xff]  ;;  %v118_v33 = vld [vmem:[#allocation4] sm:$0xff]  ;;  %v178_v34 = vld [vmem:[#allocation6 + $0x78] sm:$0xff] }
  0x19   :  { %142 = vmatpush.msra.mxu1 %v129_v12  ;;  %v177_v35 = vld [vmem:[#allocation6 + $0x70] sm:$0xff]  ;;  %183 = vmatpush.msra.mxu2 %v178_v34  ;;  %v176_v36 = vld [vmem:[#allocation6 + $0x68] sm:$0xff]  ;;  %v175_v37 = vld [vmem:[#allocation6 + $0x60] sm:$0xff] }
  0x1a   :  { %101 = vmatpush.msra.mxu0 %v84_v9  ;;  %220 = vmatpush.msra.mxu3 %v84_v9  ;;  %v174_v38 = vld [vmem:[#allocation6 + $0x58] sm:$0xff]  ;;  %v173_v39 = vld [vmem:[#allocation6 + $0x50] sm:$0xff]  ;;  %v172_v40 = vld [vmem:[#allocation6 + $0x48] sm:$0xff] }
  0x1b   :  { %143 = vmatpush.msra.mxu1 %v128_v14  ;;  %184 = vmatpush.msra.mxu2 %v177_v35  ;;  %v171_v41 = vld [vmem:[#allocation6 + $0x40] sm:$0xff]  ;;  %v170_v42 = vld [vmem:[#allocation6 + $0x38] sm:$0xff]  ;;  %v169_v43 = vld [vmem:[#allocation6 + $0x30] sm:$0xff] }
  0x1c   :  { %102 = vmatpush.msra.mxu0 %v83_v11  ;;  %221 = vmatpush.msra.mxu3 %v83_v11  ;;  %v235_v44 = vld [vmem:[%s391_s2] ss:$0 sm:$0xff]  ;;  %v168_v45 = vld [vmem:[#allocation6 + $0x28] sm:$0xff]  ;;  %v166_v49 = vld [vmem:[#allocation6 + $0x18] sm:$0xff] }
  0x1d   :  { %144 = vmatpush.msra.mxu1 %v127_v16  ;;  %185 = vmatpush.msra.mxu2 %v176_v36  ;;  %v167_v46 = vld [vmem:[#allocation6 + $0x20] sm:$0xff]  ;;  %v165_v52 = vld [vmem:[#allocation6 + $0x10] sm:$0xff]  ;;  %v164_v53 = vld [vmem:[#allocation6 + $0x8] sm:$0xff] }
  0x1e   :  { %103 = vmatpush.msra.mxu0 %v82_v13  ;;  %222 = vmatpush.msra.mxu3 %v82_v13  ;;  %v163_v54 = vld [vmem:[#allocation6] sm:$0xff] }
  0x1f   :  { %145 = vmatpush.msra.mxu1 %v126_v18  ;;  %186 = vmatpush.msra.mxu2 %v175_v37  ;;  %v236_v55 = vld [vmem:[%s393_s4] ss:$0 sm:$0xff] }
  0x20   :  { %104 = vmatpush.msra.mxu0 %v81_v15  ;;  %223 = vmatpush.msra.mxu3 %v81_v15  ;;  %v237_v62 = vld [vmem:[%s395_s6] ss:$0 sm:$0xff] }
  0x21   :  { %146 = vmatpush.msra.mxu1 %v125_v20  ;;  %187 = vmatpush.msra.mxu2 %v174_v38 }
  0x22   :  { %105 = vmatpush.msra.mxu0 %v80_v17  ;;  %224 = vmatpush.msra.mxu3 %v80_v17 }
  0x23   :  { %147 = vmatpush.msra.mxu1 %v124_v22  ;;  %188 = vmatpush.msra.mxu2 %v173_v39 }
  0x24   :  { %106 = vmatpush.msra.mxu0 %v79_v19  ;;  %225 = vmatpush.msra.mxu3 %v79_v19 }
  0x25   :  { %148 = vmatpush.msra.mxu1 %v123_v24  ;;  %189 = vmatpush.msra.mxu2 %v172_v40 }
  0x26   :  { %107 = vmatpush.msra.mxu0 %v78_v21  ;;  %226 = vmatpush.msra.mxu3 %v78_v21 }
  0x27   :  { %149 = vmatpush.msra.mxu1 %v122_v26  ;;  %190 = vmatpush.msra.mxu2 %v171_v41 }
  0x28   :  { %108 = vmatpush.msra.mxu0 %v77_v23  ;;  %227 = vmatpush.msra.mxu3 %v77_v23 }
  0x29   :  { %150 = vmatpush.msra.mxu1 %v121_v30  ;;  %191 = vmatpush.msra.mxu2 %v170_v42 }
  0x2a   :  { %109 = vmatpush.msra.mxu0 %v76_v25  ;;  %228 = vmatpush.msra.mxu3 %v76_v25 }
  0x2b   :  { %151 = vmatpush.msra.mxu1 %v120_v31  ;;  %192 = vmatpush.msra.mxu2 %v169_v43 }
  0x2c   :  { %110 = vmatpush.msra.mxu0 %v75_v27  ;;  %229 = vmatpush.msra.mxu3 %v75_v27 }
  0x2d   :  { %111 = vmatmul.f32.vlgmr.msra.gmra.mxu0 %v73_v28  ;;  %114 = vmatmul.f32.vlgmr.msra.gmra.mxu3 %v74_v29 }
  0x2e   :  { %152 = vmatpush.msra.mxu1 %v119_v32  ;;  %193 = vmatpush.msra.mxu2 %v168_v45 }
  0x30   :  { %153 = vmatpush.msra.mxu1 %v118_v33  ;;  %194 = vmatpush.msra.mxu2 %v167_v46 }
  0x32   :  { %195 = vmatpush.msra.mxu2 %v166_v49 }
  0x34   :  { %196 = vmatpush.msra.mxu2 %v165_v52 }
  0x36   :  { %197 = vmatpush.msra.mxu2 %v164_v53 }
  0x38   :  { %198 = vmatpush.msra.mxu2 %v163_v54 }
  0xaa   :  { %v112_v47 = vpop.f32.mrf.mxu0 }
  0xab   :  { %v113_v48 = vadd.f32 %v235_v44, %v112_v47 }
  0xad   :  { %154 = vmatmul.f32.vlgmr.msra.gmra.mxu1 %v113_v48 }
  0xb0   :  { %v115_v50 = vpop.f32.mrf.mxu3 }
  0xb1   :  { %v116_v51 = vadd.f32 %v235_v44, %v115_v50 }
  0xb5   :  { %157 = vmatmul.f32.gmra.mxu1 %v116_v51 }
 0x12a   :  { %v155_v56 = vpop.f32.mrf.mxu1 }
 0x12b   :  { %v156_v57 = vadd.f32 %v236_v55, %v155_v56 }
 0x12d   :  { %v161_v58 = vmax.f32 %v156_v57, 0.0 }
 0x12f   :  { %199 = vmatmul.f32.vlgmr.msra.gmra.mxu2 %v161_v58 }
 0x132   :  { %v158_v59 = vpop.f32.mrf.mxu1 }
 0x133   :  { %v159_v60 = vadd.f32 %v236_v55, %v158_v59 }
 0x135   :  { %v162_v61 = vmax.f32 %v159_v60, 0.0 }
 0x137   :  { %202 = vmatmul.f32.gmra.mxu2 %v162_v61 }
 0x1b2   :  { %v200_v63 = vpop.f32.mrf.mxu2 }
 0x1b3   :  { %v201_v0 = vadd.f32 %v237_v62, %v200_v63 }
 0x1b5   :  { %206 = vst [vmem:[%s396_s7] sm:$0xff] %v201_v0 }
 0x1ba   :  { %v203_v1 = vpop.f32.mrf.mxu2 }
 0x1bb   :  { %v204_v2 = vadd.f32 %v237_v62, %v203_v1 }
 0x1bd   :  { %207 = vst [vmem:[%s396_s7 + $0x8] sm:$0xff] %v204_v2 }
 0x1be   :  { %212 = vsyncpa [#allocation3], 1 }
 0x1bf   :  { %213 = vsyncpa [#allocation5], 1 }

</bundles_post_ra>
